<compile_context>
chip_gen: v7x
topology: tpu7x:2x2x1
jax: 0.10.0
libtpu: 0.0.40
codegen_flags: <defaults>
</compile_context>

<pallas_src>
import jax
import jax.numpy as jnp
from jax import lax
from jax.experimental import pallas as pl
from jax.experimental.pallas import tpu as pltpu


# ---------------------------------------------------------------------------
# Kernel: fused MLP_Res + outer ReLU, NCL layout.
# ---------------------------------------------------------------------------
def _mlp_res_relu_kernel(x_ref, w1s_ref, b1s_ref, w2_ref, b2_ref, o_ref):
    # x_ref : (1, Cin, TN)          NCL tile, TN on the lane axis
    # w1s   : (H + Cout, Cin)       rows [0:H) = conv_1, rows [H:) = conv_shortcut
    # b1s   : (H + Cout, 1)
    # w2    : (Cout, H), b2: (Cout, 1)
    # o_ref : (1, Cout, TN)
    x = x_ref[0]                                                  # (Cin, TN), native dtype

    # Fused conv_1 | conv_shortcut : one MXU pass over x.
    hs = jnp.dot(w1s_ref[...], x,
                 preferred_element_type=jnp.float32) + b1s_ref[...]   # (H+Cout, TN) f32

    H = w2_ref.shape[1]
    h = jnp.maximum(hs[:H, :], 0.0)                               # relu(conv_1(x))
    s = hs[H:, :]                                                 # conv_shortcut(x)

    # conv_2
    y = jnp.dot(w2_ref[...], h.astype(w2_ref.dtype),
                preferred_element_type=jnp.float32) + b2_ref[...]     # (Cout, TN) f32

    # residual add + outer ReLU of Upsampling_unit, lane-dense store.
    o_ref[0] = jnp.maximum(y + s, 0.0).astype(o_ref.dtype)


def _pick_tile(n, tile_n):
    if tile_n is not None:
        assert n % tile_n == 0, "N must be a multiple of tile_n"
        return tile_n
    for t in (2048, 1024, 512, 256, 128):
        if n % t == 0:
            return t
    return n  # ragged / tiny N: a single full-width block (still a legal BlockSpec)


# ---------------------------------------------------------------------------
# Wrapper: full Upsampling_unit forward.
# ---------------------------------------------------------------------------
def upsampling_unit_forward(point_feat, points, params, *, up_ratio=2, tile_n=None):
    """point_feat: (B, Cin, N), points: (B, 3, N)
       -> (up_feat (B, Cout, up_ratio*N), duplicated_point (B, 3, up_ratio*N))"""
    w1, b1, w2, b2, ws, bs = params
    B, Cin, N = point_feat.shape
    H = w1.shape[0]
    Cout = w2.shape[0]

    # Pack the two x-consuming convs into one weight / bias (native PyTorch (Cout,Cin)).
    w1s = jnp.concatenate([w1, ws], axis=0)                        # (H + Cout, Cin)
    b1s = jnp.concatenate([b1, bs], axis=0)[:, None]               # (H + Cout, 1)
    b2c = b2[:, None]                                              # (Cout, 1)

    tile = _pick_tile(N, tile_n)
    grid = (B, N // tile)

    feat = pl.pallas_call(
        _mlp_res_relu_kernel,
        out_shape=jax.ShapeDtypeStruct((B, Cout, N), point_feat.dtype),
        grid_spec=pltpu.PrefetchScalarGridSpec(
            num_scalar_prefetch=0,
            grid=grid,
            in_specs=[
                pl.BlockSpec((1, Cin, tile), lambda b, n: (b, 0, n)),    # x tile (NCL)
                pl.BlockSpec((H + Cout, Cin), lambda b, n: (0, 0)),      # w1 | ws
                pl.BlockSpec((H + Cout, 1), lambda b, n: (0, 0)),        # b1 | bs
                pl.BlockSpec((Cout, H), lambda b, n: (0, 0)),            # w2
                pl.BlockSpec((Cout, 1), lambda b, n: (0, 0)),            # b2
            ],
            out_specs=pl.BlockSpec((1, Cout, tile), lambda b, n: (b, 0, n)),
        ),
        compiler_params=pltpu.CompilerParams(
            dimension_semantics=("parallel", "parallel")),
    )(point_feat, w1s, b1s, w2, b2c)

    # Nearest upsample commutes exactly with 1x1 convs + ReLU, so duplicate the
    # (2x smaller) kernel output instead of the input.
    up_feat = jnp.repeat(feat, up_ratio, axis=2)                   # (B, Cout, up_ratio*N)

    # TODO(synk): up_mesh.Upsampling source is not provided in the spec; its `.up()`
    # is approximated here by nearest-neighbor duplication of the points.
    duplicated_point = jnp.repeat(points, up_ratio, axis=2)        # (B, 3, up_ratio*N)

    return up_feat, duplicated_point


# ---------------------------------------------------------------------------
# Parameters (PyTorch Conv1d(k=1) weights stored natively as (Cout, Cin)).
# ---------------------------------------------------------------------------
def init_params(key, in_dim, hidden_dim, out_dim, dtype=jnp.float32):
    ks = jax.random.split(key, 6)
    s1 = 1.0 / jnp.sqrt(in_dim)
    s2 = 1.0 / jnp.sqrt(hidden_dim)
    w1 = (jax.random.normal(ks[0], (hidden_dim, in_dim)) * s1).astype(dtype)
    b1 = (jax.random.normal(ks[1], (hidden_dim,)) * s1).astype(dtype)
    w2 = (jax.random.normal(ks[2], (out_dim, hidden_dim)) * s2).astype(dtype)
    b2 = (jax.random.normal(ks[3], (out_dim,)) * s2).astype(dtype)
    ws = (jax.random.normal(ks[4], (out_dim, in_dim)) * s1).astype(dtype)
    bs = (jax.random.normal(ks[5], (out_dim,)) * s1).astype(dtype)
    return (w1, b1, w2, b2, ws, bs)


# ---------------------------------------------------------------------------
# Pure-JAX reference in the literal PyTorch order (upsample first, then MLP).
# ---------------------------------------------------------------------------
def upsampling_unit_reference(point_feat, points, params, up_ratio=2):
    w1, b1, w2, b2, ws, bs = params

    def conv1x1(w, b, t):
        return jnp.einsum('oc,bcn->bon', w, t,
                          precision=lax.Precision.HIGHEST) + b[None, :, None]

    xd = jnp.repeat(point_feat, up_ratio, axis=2)                  # nn.Upsample (nearest)
    h = jnp.maximum(conv1x1(w1, b1, xd), 0.0)
    out = conv1x1(w2, b2, h) + conv1x1(ws, bs, xd)
    up_feat = jnp.maximum(out, 0.0)
    dup_point = jnp.repeat(points, up_ratio, axis=2)
    return up_feat, dup_point


if __name__ == "__main__":
    key = jax.random.PRNGKey(0)
    k_f, k_p, k_w = jax.random.split(key, 3)

    # Upsampling_unit fixes the feature width at 128 channels; keep N small.
    B, C, N, up_ratio = 2, 128, 256, 2
    point_feat = jax.random.normal(k_f, (B, C, N), dtype=jnp.float32)
    points = jax.random.normal(k_p, (B, 3, N), dtype=jnp.float32)
    params = init_params(k_w, C, C, C)

    up_feat, dup_pt = upsampling_unit_forward(point_feat, points, params,
                                              up_ratio=up_ratio)
    up_feat = jax.block_until_ready(up_feat)
    dup_pt = jax.block_until_ready(dup_pt)

    ref_feat, ref_pt = upsampling_unit_reference(point_feat, points, params, up_ratio)

    assert up_feat.shape == (B, C, up_ratio * N)
    assert dup_pt.shape == (B, 3, up_ratio * N)
    assert jnp.allclose(up_feat, ref_feat, atol=1e-3, rtol=1e-3), "up_feat mismatch"
    assert jnp.allclose(dup_pt, ref_pt), "duplicated_point mismatch"

    print("KERNEL_OK")
</pallas_src>

<mosaic_0001>
module attributes {stable_mosaic.version = 11 : i64} {
  func.func @_mlp_res_relu_kernel(%arg0: i32, %arg1: i32, %arg2: memref<1x128x256xf32, #tpu.memory_space<vmem>>, %arg3: memref<256x128xf32, #tpu.memory_space<vmem>>, %arg4: memref<256x1xf32, #tpu.memory_space<vmem>>, %arg5: memref<128x128xf32, #tpu.memory_space<vmem>>, %arg6: memref<128x1xf32, #tpu.memory_space<vmem>>, %arg7: memref<1x128x256xf32, #tpu.memory_space<vmem>>) attributes {dimension_semantics = [#tpu.dimension_semantics<parallel>, #tpu.dimension_semantics<parallel>], iteration_bounds = array<i64: 2, 1>, scalar_prefetch = 0 : i64, scratch_operands = 0 : i64, tpu.core_type = #tpu.core_type<tc>, window_params = [{transform_indices = @transform_0, window_bounds = array<i64: 1, 128, 256>}, {pipeline_mode = #tpu.pipeline_mode<synchronous>, transform_indices = @transform_1, window_bounds = array<i64: 256, 128>}, {pipeline_mode = #tpu.pipeline_mode<synchronous>, transform_indices = @transform_2, window_bounds = array<i64: 256, 1>}, {pipeline_mode = #tpu.pipeline_mode<synchronous>, transform_indices = @transform_3, window_bounds = array<i64: 128, 128>}, {pipeline_mode = #tpu.pipeline_mode<synchronous>, transform_indices = @transform_4, window_bounds = array<i64: 128, 1>}, {transform_indices = @transform_5, window_bounds = array<i64: 1, 128, 256>}]} {
    %c0 = arith.constant 0 : index
    %c0_0 = arith.constant 0 : index
    %c0_1 = arith.constant 0 : index
    %0 = vector.load %arg2[%c0, %c0_0, %c0_1] : memref<1x128x256xf32, #tpu.memory_space<vmem>>, vector<1x128x256xf32>
    %1 = vector.shape_cast %0 : vector<1x128x256xf32> to vector<128x256xf32>
    %c0_2 = arith.constant 0 : index
    %c0_3 = arith.constant 0 : index
    %2 = vector.load %arg3[%c0_2, %c0_3] : memref<256x128xf32, #tpu.memory_space<vmem>>, vector<256x128xf32>
    %cst = arith.constant dense<0.000000e+00> : vector<256x256xf32>
    %3 = tpu.matmul %2, %1, %cst {dimension_numbers = #tpu.dot_dimension_numbers<[1], [0], [0], [1], [0, 0, 1, 1], [], []>} : vector<256x128xf32>, vector<128x256xf32>, vector<256x256xf32> -> vector<256x256xf32>
    %c0_4 = arith.constant 0 : index
    %c0_5 = arith.constant 0 : index
    %4 = vector.load %arg4[%c0_4, %c0_5] : memref<256x1xf32, #tpu.memory_space<vmem>>, vector<256x1xf32>
    %5 = vector.broadcast %4 : vector<256x1xf32> to vector<256x256xf32>
    %6 = arith.addf %3, %5 : vector<256x256xf32>
    %7 = vector.extract_strided_slice %6 {offsets = [0, 0], sizes = [128, 256], strides = [1, 1]} : vector<256x256xf32> to vector<128x256xf32>
    %cst_6 = arith.constant 0.000000e+00 : f32
    %8 = vector.broadcast %cst_6 : f32 to vector<128x256xf32>
    %9 = arith.maximumf %7, %8 : vector<128x256xf32>
    %10 = vector.extract_strided_slice %6 {offsets = [128, 0], sizes = [128, 256], strides = [1, 1]} : vector<256x256xf32> to vector<128x256xf32>
    %c0_7 = arith.constant 0 : index
    %c0_8 = arith.constant 0 : index
    %11 = vector.load %arg5[%c0_7, %c0_8] : memref<128x128xf32, #tpu.memory_space<vmem>>, vector<128x128xf32>
    %cst_9 = arith.constant dense<0.000000e+00> : vector<128x256xf32>
    %12 = tpu.matmul %11, %9, %cst_9 {dimension_numbers = #tpu.dot_dimension_numbers<[1], [0], [0], [1], [0, 0, 1, 1], [], []>} : vector<128x128xf32>, vector<128x256xf32>, vector<128x256xf32> -> vector<128x256xf32>
    %c0_10 = arith.constant 0 : index
    %c0_11 = arith.constant 0 : index
    %13 = vector.load %arg6[%c0_10, %c0_11] : memref<128x1xf32, #tpu.memory_space<vmem>>, vector<128x1xf32>
    %14 = vector.broadcast %13 : vector<128x1xf32> to vector<128x256xf32>
    %15 = arith.addf %12, %14 : vector<128x256xf32>
    %16 = arith.addf %15, %10 : vector<128x256xf32>
    %cst_12 = arith.constant 0.000000e+00 : f32
    %17 = vector.broadcast %cst_12 : f32 to vector<128x256xf32>
    %18 = arith.maximumf %16, %17 : vector<128x256xf32>
    %c0_13 = arith.constant 0 : index
    %c0_14 = arith.constant 0 : index
    %c0_15 = arith.constant 0 : index
    %19 = vector.load %arg7[%c0_13, %c0_14, %c0_15] : memref<1x128x256xf32, #tpu.memory_space<vmem>>, vector<1x128x256xf32>
    %20 = vector.shape_cast %19 : vector<1x128x256xf32> to vector<128x256xf32>
    %21 = vector.shape_cast %18 : vector<128x256xf32> to vector<1x128x256xf32>
    tpu.vector_store %arg7[%c0_13, %c0_14, %c0_15], %21 {strides = array<i32>} : memref<1x128x256xf32, #tpu.memory_space<vmem>>, vector<1x128x256xf32>,
    return
  }
  func.func @transform_0(%arg0: i32, %arg1: i32) -> (i32, i32, i32) {
    %c0_i32 = arith.constant 0 : i32
    %c0_i32_0 = arith.constant 0 : i32
    return %arg0, %c0_i32, %arg1 : i32, i32, i32
  }
  func.func @transform_1(%arg0: i32, %arg1: i32) -> (i32, i32) {
    %c0_i32 = arith.constant 0 : i32
    %c0_i32_0 = arith.constant 0 : i32
    %c0_i32_1 = arith.constant 0 : i32
    return %c0_i32, %c0_i32_0 : i32, i32
  }
  func.func @transform_2(%arg0: i32, %arg1: i32) -> (i32, i32) {
    %c0_i32 = arith.constant 0 : i32
    %c0_i32_0 = arith.constant 0 : i32
    %c0_i32_1 = arith.constant 0 : i32
    return %c0_i32, %c0_i32_0 : i32, i32
  }
  func.func @transform_3(%arg0: i32, %arg1: i32) -> (i32, i32) {
    %c0_i32 = arith.constant 0 : i32
    %c0_i32_0 = arith.constant 0 : i32
    %c0_i32_1 = arith.constant 0 : i32
    return %c0_i32, %c0_i32_0 : i32, i32
  }
  func.func @transform_4(%arg0: i32, %arg1: i32) -> (i32, i32) {
    %c0_i32 = arith.constant 0 : i32
    %c0_i32_0 = arith.constant 0 : i32
    %c0_i32_1 = arith.constant 0 : i32
    return %c0_i32, %c0_i32_0 : i32, i32
  }
  func.func @transform_5(%arg0: i32, %arg1: i32) -> (i32, i32, i32) {
    %c0_i32 = arith.constant 0 : i32
    %c0_i32_0 = arith.constant 0 : i32
    return %arg0, %c0_i32, %arg1 : i32, i32, i32
  }
}

</mosaic_0001>

<bundles_post_ra>
// kernel: tpu_custom_call.1
= control target key start
LH: loop header
LB: loop body
LE: loop exit
PB: predicated region body
PF: predicated region fallthrough
CT: control target
= control target key end

     0   :  { %10 = vsyncpa [#allocation3], 0  ;;  %s2447_s0 = inlined_call_operand.hbm [shape: f32[2,128,256], index: 0, kind: input, shape index: {}]   ;;  %s2448_s1 = inlined_call_operand.vmem [shape: f32[256,128], index: 1, kind: input, shape index: {}]   ;;  %s2449_s2 = inlined_call_operand.vmem [shape: f32[256,1], index: 2, kind: input, shape index: {}]   ;;  %s2450_s3 = inlined_call_operand.vmem [shape: f32[128,128], index: 3, kind: input, shape index: {}]   ;;  %s2451_s4 = inlined_call_operand.vmem [shape: f32[128,1], index: 4, kind: input, shape index: {}]   ;;  %s2452_s5 = inlined_call_operand.hbm [shape: f32[2,128,256], index: 5, kind: output, shape index: {}]  }
   0x1   :  { %12 = vsyncpa [#allocation3 + $0x1], 0 }
   0x2   :  { %13 = vsyncpa [#allocation4], 0 }
   0x3   :  { %15 = vsyncpa [#allocation4 + $0x1], 0  ;;  %s1695_s18 = smov 0   ;;  %s1697_s19 = smov 0  }
   0x4   :  { %s1699_s20 = smov 0   ;;  %s1701_s21 = smov 0  }
   0x5   :  { %s1703_s22 = smov 0   ;;  %s1705_s23 = smov 0  }
   0x6 LB: > { %s1280_s24 = sadd.s32 4294967295, %s1655_s23   ;;  %s1281_s25 = sadd.s32 4294967294, %s1655_s23   ;;  %s1655_s23 = sphi %s1705_s23, %s21_s23   ;;  %s1651_s22 = sphi %s1703_s22, %s2467_s22   ;;  %s1647_s21 = sphi %s1701_s21, %s2466_s21   ;;  %s1643_s20 = sphi %s1699_s20, %s2465_s20   ;;  %s1639_s19 = sphi %s1697_s19, %s2464_s19   ;;  %s1635_s18 = sphi %s1695_s18, %s2463_s18  }
   0x7   : > { %s33_s26 = sadd.s32 1, %s1651_s22  ;;  %s42_s27 = sadd.s32 1, %s1643_s20 }
   0x8   : > { %p35_p0 = scmp.ge.s32.totalorder %s33_s26, 2  ;;  %p49_p1 = scmp.ne.s32.totalorder %s1643_s20, %s1639_s19 }
   0x9   : > { %p50_p2 = scmp.eq.s32.totalorder %s1655_s23, 0  ;;  %p55_p3 = scmp.ne.s32.totalorder %s1639_s19, %s1635_s18 }
   0xa   : > { %s2469_s26 = smov (%p35_p0, %s33_s26), 0  ;;  %p56_p5 = scmp.eq.s32.totalorder %s1280_s24, 0 }
   0xb   : > { %p1736_p4 = por %p50_p2, %p49_p1  ;;  %s37_s29 = ssub.s32 %s1651_s22, %s2469_s26 }
   0xc   : > { %p165_p6 = scmp.eq.s32.totalorder %s1280_s24, 1  ;;  %p40_p7 = scmp.eq.s32.totalorder %s37_s29, 0 }
   0xd   : > { %p1742_p8 = por %p56_p5, %p55_p3  ;;  %p171_p10 = scmp.eq.s32.totalorder %s1281_s25, 1 }
   0xe   : > { %p1746_p9 = por %p165_p6, %p49_p1  ;;  %p1485_p13 = scmp.lt.s32.totalorder %s1655_s23, 2 }
   0xf   : > { %s1751_s7 = scalar_select %p40_p7, %s1643_s20, %s42_s27  }
  0x10   : > { %s2456_s6 = scalar_select %p1746_p9, 1, 0 }
  0x11   : > { %p1753_p11 = por %p171_p10, %p55_p3  ;;  %s203_s9 = sand.u32 1, %s1643_s20  }
  0x12   : > { %s1284_s10 = sshll.u32 %s203_s9, 8  ;;  %s1295_s11 = sshll.u32 %s1651_s22, 12 }
  0x13   : > { %s2457_s8 = scalar_select %p1753_p11, 1, 0 }
  0x14   : > { %s1764_s14 = scalar_lea.hbm %s2447_s0, %s1295_s11  ;;  %s207_s15 = scalar_lea.vmem [#allocation2], %s1284_s10 }
  0x15   : > { %s216_s16 = sshll.u32 %s207_s15, 4  ;;  %p1770_p0 = pnand %p1485_p13, %p1736_p4  ;;  %s1766_s16 = int_to_ptr.vmem [resolvable:$true] %s216_s16 }
  0x16   : > { %s1775_s24 = scalar_lea.sflag [#allocation3], %s203_s9  ;;  %s1543_s25 = scalar_lea.hbm %s1764_s14, 4096 }
  0x17   : > { %p1544_p2 = scmp.ne.s32.totalorder %s1764_s14, %s1543_s25  ;;  %p1545_p3 = pneg %p1770_p0 }
  0x18   : > { %s1548_s28 = scalar_lea.hbm %s2447_s0, 8192  ;;  %p1549_p4 = scmp.lt.u32.totalorder %s1764_s14, %s2447_s0 }
  0x19   : > { %p1546_p5 = pnand %p1545_p3, %p1544_p2  ;;  %p1550_p7 = scmp.lt.u32.totalorder %s1548_s28, %s1543_s25 }
  0x1a   : > { %p1552_p13 = scmp.lt.u32.totalorder %s1543_s25, %s1764_s14 }
  0x1b   : > { %p1547_p6 = pneg %p1546_p5  ;;  %p1551_p10 = por %p1550_p7, %p1549_p4 }
  0x1d   : > { %p1553_p12 = por %p1552_p13, %p1551_p10 }
  0x1f   : > { %p1554_p1 = pnand %p1553_p12, %p1547_p6 }
  0x21   : > { %1557 = shalt.err (!%p1554_p1)
}
  0x22   : > { %s1558_s9 = scalar_lea.vmem %s1766_s16, 4096  ;;  %s1657_s12 = smov [#allocation2]  }
  0x23   : > { %p1559_p2 = scmp.ne.s32.totalorder %s1766_s16, %s1558_s9  ;;  %s1563_s13 = sshll.u32 %s1657_s12, 4  ;;  %s1564_s13 = int_to_ptr.vmem [resolvable:$false] %s1563_s13 }
  0x24   : > { %s1565_s15 = scalar_lea.vmem %s1564_s13, 8192  ;;  %p1566_p9 = scmp.lt.s32.totalorder %s1766_s16, %s1564_s13 }
  0x25   : > { %p1561_p5 = pnand %p1559_p2, %p1545_p3  ;;  %p1567_p4 = scmp.lt.s32.totalorder %s1565_s15, %s1558_s9 }
  0x27   : > { %p1562_p11 = pneg %p1561_p5  ;;  %p1568_p7 = por %p1567_p4, %p1566_p9 }
  0x29   : > { %p1569_p10 = pnand %p1568_p7, %p1562_p11 }
  0x2b   : > { %1572 = shalt.err (!%p1569_p10)
}
  0x2c   : > { %s1658_s25 = smov 256   ;;  %s1659_s27 = smov 16  }
  0x2d   : > { %1480 = dma.hbm_to_vmem [thread:$0]  (!%p1770_p0), %s1764_s14, 4096, %s1766_s16, %s1775_s24, %s1658_s25, %s1658_s25, %s1659_s27  }
  0x2e   : > { %p224_p12 = scmp.lt.s32.totalorder %s1655_s23, 3  ;;  %p2459_p1 = scmp.ge.s32.totalorder %s1655_s23, 1 }
  0x30   : > { %p225_p3 = pnand %p2459_p1, %p224_p12 }
  0x31   : > { %s1807_s29 = sand.u32 (!%p225_p3), 1, %s1639_s19  }
  0x32   : > { %228 = sbr.rel (%p225_p3) target bundleno = 652 (0x28c), region = 40  ;;  %s1288_s28 = sshll.u32 (!%p225_p3), %s1807_s29, 8 }
  0x33   : > { %s231_s10 = scalar_lea.sflag (!%p225_p3), [#allocation3], %s1807_s29  ;;  %s1813_s11 = scalar_lea.vmem (!%p225_p3), [#allocation2], %s1288_s28 }
  0x39   : > { %1626 = dma.done.wait (%p1742_p8), %s231_s10, 4096  }
  0x3a   : > { %1628 = vsyncadd (%p1742_p8), %s231_s10, 4294963200  ;;  %v1660_v0 = vmov 0.0   ;;  %v1661_v1 = vmov 0   ;;  %v264_v2 = vld [vmem:[%s1813_s11 + $0x8] sm:$0xff]  ;;  %v266_v3 = vld [vmem:[%s1813_s11 + $0x18] sm:$0xff]  ;;  %s2309_s27 = scalar_lea.vmem [#allocation5], %s1288_s28 }
  0x3b   : > { %583 = vmatprep.mubr.f32.mxu0 %v1660_v0  ;;  %631 = vmatprep.mubr.f32.mxu1 %v1660_v0  ;;  %v263_v4 = vld [vmem:[%s1813_s11] sm:$0xff]  ;;  %v1297_v5 = vpack.c.bf16 %v266_v3, %v264_v2  ;;  %v265_v6 = vld [vmem:[%s1813_s11 + $0x10] sm:$0xff]  ;;  %v268_v7 = vld [vmem:[%s1813_s11 + $0x28] sm:$0xff]  ;;  %s1296_s28 = sshll.u32 %s1647_s21, 12  ;;  %s1193_s10 = sshll.u32 %s2309_s27, 4  ;;  %s2396_s10 = int_to_ptr.vmem [resolvable:$true] %s1193_s10 }
  0x3c   : > { %1541 = vset.pattern.permute.xlu0 %v1661_v1  ;;  %1542 = vset.pattern.permute.xlu1 %v1661_v1  ;;  %v270_v8 = vld [vmem:[%s1813_s11 + $0x38] sm:$0xff]  ;;  %v1299_v9 = vpack.c.bf16 %v265_v6, %v263_v4  ;;  %v267_v11 = vld [vmem:[%s1813_s11 + $0x20] sm:$0xff]  ;;  %v269_v12 = vld [vmem:[%s1813_s11 + $0x30] sm:$0xff]  ;;  %s2394_s16 = scalar_lea.hbm %s2452_s5, %s1296_s28  ;;  %s1178_s21 = scalar_lea.sflag [#allocation4], %s1807_s29 }
  0x3d   : > { %v1301_v10 = vpack.c.bf16 %v270_v8, %v268_v7  ;;  %v272_v13 = vld [vmem:[%s1813_s11 + $0x48] sm:$0xff]  ;;  %1298 = vmatprep.subr.bf16.mxu0 %v1297_v5  ;;  %1361 = vmatprep.subr.bf16.mxu1 %v1297_v5  ;;  %v274_v14 = vld [vmem:[%s1813_s11 + $0x58] sm:$0xff]  ;;  %v1303_v15 = vpack.c.bf16 %v269_v12, %v267_v11  ;;  %v271_v17 = vld [vmem:[%s1813_s11 + $0x40] sm:$0xff]  ;;  %s1573_s17 = scalar_lea.vmem %s2396_s10, 4096  ;;  %p2460_p9 = scmp.ne.s32.totalorder %s2456_s6, 0 }
  0x3e   : > { %1300 = vmatpush1.bf16.msra.mxu0 %v1299_v9  ;;  %1369 = vmatpush1.bf16.msra.mxu1 %v1299_v9  ;;  %v1305_v16 = vpack.c.bf16 %v274_v14, %v272_v13  ;;  %v273_v18 = vld [vmem:[%s1813_s11 + $0x50] sm:$0xff]  ;;  %v276_v19 = vld [vmem:[%s1813_s11 + $0x68] sm:$0xff]  ;;  %v278_v20 = vld [vmem:[%s1813_s11 + $0x78] sm:$0xff]  ;;  %p1574_p8 = scmp.ne.s32.totalorder %s2396_s10, %s1573_s17  ;;  %s1662_s24 = smov [#allocation5]  }
  0x3f   : > { %1302 = vmatprep.subr.bf16.mxu0 %v1301_v10  ;;  %1362 = vmatprep.subr.bf16.mxu1 %v1301_v10  ;;  %v1307_v21 = vpack.c.bf16 %v273_v18, %v271_v17  ;;  %v1309_v22 = vpack.c.bf16 %v278_v20, %v276_v19  ;;  %v275_v23 = vld [vmem:[%s1813_s11 + $0x60] sm:$0xff]  ;;  %v277_v24 = vld [vmem:[%s1813_s11 + $0x70] sm:$0xff]  ;;  %v280_v25 = vld [vmem:[%s1813_s11 + $0x88] sm:$0xff]  ;;  %s1577_s9 = sshll.u32 %s1662_s24, 4  ;;  %s1578_s9 = int_to_ptr.vmem [resolvable:$false] %s1577_s9 }
  0x40   : > { %v282_v26 = vld [vmem:[%s1813_s11 + $0x98] sm:$0xff]  ;;  %v1311_v27 = vpack.c.bf16 %v277_v24, %v275_v23  ;;  %v327_v28 = vld [vmem:[%s2449_s2] sm:$0xff]  ;;  %v281_v31 = vld [vmem:[%s1813_s11 + $0x90] sm:$0xff]  ;;  %p1575_p11 = pnand %p1574_p8, %p2460_p9  ;;  %s1579_s12 = scalar_lea.vmem %s1578_s9, 8192 }
  0x41   : > { %v1313_v29 = vpack.c.bf16 %v282_v26, %v280_v25  ;;  %v279_v30 = vld [vmem:[%s1813_s11 + $0x80] sm:$0xff]  ;;  %v329_v32 = vld [vmem:[%s2449_s2 + $0x10] sm:$0xff]  ;;  %v284_v33 = vld [vmem:[%s1813_s11 + $0xa8] sm:$0xff]  ;;  %361 = vperm.xlu0 %1541, %v327_v28   ;;  %p1580_p6 = scmp.lt.s32.totalorder %s2396_s10, %s1578_s9  ;;  %p1581_p13 = scmp.lt.s32.totalorder %s1579_s12, %s1573_s17 }
  0x42   : > { %1304 = vmatpush1.bf16.msra.mxu0 %v1303_v15  ;;  %1370 = vmatpush1.bf16.msra.mxu1 %v1303_v15  ;;  %v286_v34 = vld [vmem:[%s1813_s11 + $0xb8] sm:$0xff]  ;;  %v328_v35 = vld [vmem:[%s2449_s2 + $0x8] sm:$0xff]  ;;  %v1315_v37 = vpack.c.bf16 %v281_v31, %v279_v30  ;;  %v283_v39 = vld [vmem:[%s1813_s11 + $0xa0] sm:$0xff]  ;;  %p1576_p0 = pneg %p1575_p11 }
  0x43   : > { %1306 = vmatprep.subr.bf16.mxu0 %v1305_v16  ;;  %1363 = vmatprep.subr.bf16.mxu1 %v1305_v16  ;;  %v330_v36 = vld [vmem:[%s2449_s2 + $0x18] sm:$0xff]  ;;  %v1317_v38 = vpack.c.bf16 %v286_v34, %v284_v33  ;;  %v285_v40 = vld [vmem:[%s1813_s11 + $0xb0] sm:$0xff]  ;;  %v288_v41 = vld [vmem:[%s1813_s11 + $0xc8] sm:$0xff]  ;;  %p1582_p2 = por %p1581_p13, %p1580_p6 }
  0x44   : > { %371 = vperm.xlu1 %1542, %v329_v32   ;;  %v290_v42 = vld [vmem:[%s1813_s11 + $0xd8] sm:$0xff]  ;;  %v331_v43 = vld [vmem:[%s2449_s2 + $0x20] sm:$0xff]  ;;  %v332_v44 = vld [vmem:[%s2449_s2 + $0x28] sm:$0xff]  ;;  %v1319_v45 = vpack.c.bf16 %v285_v40, %v283_v39 }
  0x45   : > { %366 = vperm.xlu0 %1541, %v328_v35   ;;  %v1321_v46 = vpack.c.bf16 %v290_v42, %v288_v41  ;;  %v287_v47 = vld [vmem:[%s1813_s11 + $0xc0] sm:$0xff]  ;;  %v289_v48 = vld [vmem:[%s1813_s11 + $0xd0] sm:$0xff]  ;;  %v292_v49 = vld [vmem:[%s1813_s11 + $0xe8] sm:$0xff]  ;;  %p1583_p5 = pnand %p1582_p2, %p1576_p0 }
  0x46   : > { %1308 = vmatpush1.bf16.msra.mxu0 %v1307_v21  ;;  %1371 = vmatpush1.bf16.msra.mxu1 %v1307_v21  ;;  %v294_v50 = vld [vmem:[%s1813_s11 + $0xf8] sm:$0xff]  ;;  %v333_v51 = vld [vmem:[%s2449_s2 + $0x30] sm:$0xff]  ;;  %v1323_v53 = vpack.c.bf16 %v289_v48, %v287_v47  ;;  %v291_v55 = vld [vmem:[%s1813_s11 + $0xe0] sm:$0xff] }
  0x47   : > { %1310 = vmatprep.subr.bf16.mxu0 %v1309_v22  ;;  %1364 = vmatprep.subr.bf16.mxu1 %v1309_v22  ;;  %v334_v52 = vld [vmem:[%s2449_s2 + $0x38] sm:$0xff]  ;;  %v1325_v54 = vpack.c.bf16 %v294_v50, %v292_v49  ;;  %v293_v56 = vld [vmem:[%s1813_s11 + $0xf0] sm:$0xff]  ;;  %v335_v57 = vld [vmem:[%s2449_s2 + $0x40] sm:$0xff] }
  0x48   : > { %376 = vperm.xlu1 %1542, %v330_v36   ;;  %v336_v58 = vld [vmem:[%s2449_s2 + $0x48] sm:$0xff]  ;;  %v1327_v59 = vpack.c.bf16 %v293_v56, %v291_v55  ;;  %v337_v60 = vld [vmem:[%s2449_s2 + $0x50] sm:$0xff]  ;;  %v338_v61 = vld [vmem:[%s2449_s2 + $0x58] sm:$0xff] }
  0x49   : > { %381 = vperm.xlu0 %1541, %v331_v43   ;;  %v295_v62 = vld [vmem:[%s2448_s1] sm:$0xff]  ;;  %v340_v2 = vld [vmem:[%s2449_s2 + $0x68] sm:$0xff]  ;;  %v341_v5 = vld [vmem:[%s2449_s2 + $0x70] sm:$0xff] }
  0x4a   : > { %1312 = vmatpush1.bf16.msra.mxu0 %v1311_v27  ;;  %1372 = vmatpush1.bf16.msra.mxu1 %v1311_v27  ;;  %v303_v63 = vld [vmem:[%s2448_s1 + $0x40] sm:$0xff]  ;;  %v296_v3 = vld [vmem:[%s2448_s1 + $0x8] sm:$0xff]  ;;  %v342_v6 = vld [vmem:[%s2449_s2 + $0x78] sm:$0xff] }
  0x4b   : > { %1314 = vmatprep.subr.bf16.mxu0 %v1313_v29  ;;  %1365 = vmatprep.subr.bf16.mxu1 %v1313_v29  ;;  %v339_v1 = vld [vmem:[%s2449_s2 + $0x60] sm:$0xff]  ;;  %v304_v4 = vld [vmem:[%s2448_s1 + $0x48] sm:$0xff]  ;;  %v297_v7 = vld [vmem:[%s2448_s1 + $0x10] sm:$0xff] }
  0x4c   : > { %386 = vperm.xlu1 %1542, %v332_v44   ;;  %v305_v8 = vld [vmem:[%s2448_s1 + $0x50] sm:$0xff]  ;;  %v343_v9 = vld [vmem:[%s2449_s2 + $0x80] sm:$0xff]  ;;  %v344_v10 = vld [vmem:[%s2449_s2 + $0x88] sm:$0xff] }
  0x4d   : > { %391 = vperm.xlu0 %1541, %v333_v51   ;;  %v298_v11 = vld [vmem:[%s2448_s1 + $0x18] sm:$0xff]  ;;  %v345_v13 = vld [vmem:[%s2449_s2 + $0x90] sm:$0xff]  ;;  %v299_v15 = vld [vmem:[%s2448_s1 + $0x20] sm:$0xff] }
  0x4e   : > { %1316 = vmatpush1.bf16.msra.mxu0 %v1315_v37  ;;  %1373 = vmatpush1.bf16.msra.mxu1 %v1315_v37  ;;  %v306_v12 = vld [vmem:[%s2448_s1 + $0x58] sm:$0xff]  ;;  %v307_v16 = vld [vmem:[%s2448_s1 + $0x60] sm:$0xff]  ;;  %v348_v18 = vld [vmem:[%s2449_s2 + $0xa8] sm:$0xff] }
  0x4f   : > { %1318 = vmatprep.subr.bf16.mxu0 %v1317_v38  ;;  %1366 = vmatprep.subr.bf16.mxu1 %v1317_v38  ;;  %v346_v14 = vld [vmem:[%s2449_s2 + $0x98] sm:$0xff]  ;;  %v347_v17 = vld [vmem:[%s2449_s2 + $0xa0] sm:$0xff]  ;;  %v300_v19 = vld [vmem:[%s2448_s1 + $0x28] sm:$0xff] }
  0x50   : > { %396 = vperm.xlu1 %1542, %v334_v52   ;;  %v308_v20 = vld [vmem:[%s2448_s1 + $0x68] sm:$0xff]  ;;  %v349_v21 = vld [vmem:[%s2449_s2 + $0xb0] sm:$0xff]  ;;  %v350_v22 = vld [vmem:[%s2449_s2 + $0xb8] sm:$0xff] }
  0x51   : > { %401 = vperm.xlu0 %1541, %v335_v57   ;;  %v301_v23 = vld [vmem:[%s2448_s1 + $0x30] sm:$0xff]  ;;  %v351_v25 = vld [vmem:[%s2449_s2 + $0xc0] sm:$0xff]  ;;  %v352_v26 = vld [vmem:[%s2449_s2 + $0xc8] sm:$0xff] }
  0x52   : > { %1320 = vmatpush1.bf16.msra.mxu0 %v1319_v45  ;;  %1374 = vmatpush1.bf16.msra.mxu1 %v1319_v45  ;;  %v309_v24 = vld [vmem:[%s2448_s1 + $0x70] sm:$0xff]  ;;  %v302_v27 = vld [vmem:[%s2448_s1 + $0x38] sm:$0xff]  ;;  %v311_v31 = vld [vmem:[%s2448_s1 + $0x80] sm:$0xff] }
  0x53   : > { %1322 = vmatprep.subr.bf16.mxu0 %v1321_v46  ;;  %1367 = vmatprep.subr.bf16.mxu1 %v1321_v46  ;;  %v310_v28 = vld [vmem:[%s2448_s1 + $0x78] sm:$0xff]  ;;  %v353_v29 = vld [vmem:[%s2449_s2 + $0xd0] sm:$0xff]  ;;  %v355_v32 = vld [vmem:[%s2449_s2 + $0xe0] sm:$0xff] }
  0x54   : > { %406 = vperm.xlu1 %1542, %v336_v58   ;;  %v354_v30 = vld [vmem:[%s2449_s2 + $0xd8] sm:$0xff]  ;;  %v356_v33 = vld [vmem:[%s2449_s2 + $0xe8] sm:$0xff]  ;;  %v357_v35 = vld [vmem:[%s2449_s2 + $0xf0] sm:$0xff] }
  0x55   : > { %411 = vperm.xlu0 %1541, %v337_v60   ;;  %v312_v34 = vld [vmem:[%s2448_s1 + $0x88] sm:$0xff]  ;;  %v358_v36 = vld [vmem:[%s2449_s2 + $0xf8] sm:$0xff]  ;;  %v313_v37 = vld [vmem:[%s2448_s1 + $0x90] sm:$0xff] }
  0x56   : > { %1324 = vmatpush1.bf16.msra.mxu0 %v1323_v53  ;;  %1375 = vmatpush1.bf16.msra.mxu1 %v1323_v53  ;;  %v824_v38 = vld [vmem:[%s2451_s4] sm:$0xff]  ;;  %v825_v39 = vld [vmem:[%s2451_s4 + $0x8] sm:$0xff]  ;;  %v314_v40 = vld [vmem:[%s2448_s1 + $0x98] sm:$0xff] }
  0x57   : > { %1326 = vmatprep.subr.bf16.mxu0 %v1325_v54  ;;  %1368 = vmatprep.subr.bf16.mxu1 %v1325_v54  ;;  %v826_v41 = vld [vmem:[%s2451_s4 + $0x10] sm:$0xff]  ;;  %v827_v42 = vld [vmem:[%s2451_s4 + $0x18] sm:$0xff]  ;;  %v315_v43 = vld [vmem:[%s2448_s1 + $0xa0] sm:$0xff] }
  0x58   : > { %416 = vperm.xlu1 %1542, %v338_v61   ;;  %v828_v44 = vld [vmem:[%s2451_s4 + $0x20] sm:$0xff]  ;;  %v829_v45 = vld [vmem:[%s2451_s4 + $0x28] sm:$0xff]  ;;  %v830_v47 = vld [vmem:[%s2451_s4 + $0x30] sm:$0xff] }
  0x59   : > { %421 = vperm.xlu0 %1541, %v339_v1   ;;  %v316_v46 = vld [vmem:[%s2448_s1 + $0xa8] sm:$0xff]  ;;  %v831_v48 = vld [vmem:[%s2451_s4 + $0x38] sm:$0xff]  ;;  %v317_v49 = vld [vmem:[%s2448_s1 + $0xb0] sm:$0xff] }
  0x5a   : > { %1328 = vmatpush1.bf16.msra.mxu0 %v1327_v59  ;;  %1376 = vmatpush1.bf16.msra.mxu1 %v1327_v59  ;;  %v832_v50 = vld [vmem:[%s2451_s4 + $0x40] sm:$0xff]  ;;  %v833_v51 = vld [vmem:[%s2451_s4 + $0x48] sm:$0xff]  ;;  %v318_v52 = vld [vmem:[%s2448_s1 + $0xb8] sm:$0xff] }
  0x5b   : > { %v834_v53 = vld [vmem:[%s2451_s4 + $0x50] sm:$0xff]  ;;  %v835_v54 = vld [vmem:[%s2451_s4 + $0x58] sm:$0xff]  ;;  %v319_v55 = vld [vmem:[%s2448_s1 + $0xc0] sm:$0xff] }
  0x5c   : > { %426 = vperm.xlu1 %1542, %v340_v2   ;;  %v836_v56 = vld [vmem:[%s2451_s4 + $0x60] sm:$0xff]  ;;  %v837_v57 = vld [vmem:[%s2451_s4 + $0x68] sm:$0xff]  ;;  %v838_v59 = vld [vmem:[%s2451_s4 + $0x70] sm:$0xff] }
  0x5d   : > { %584 = vmatmul.mubr.f32.vlgmr.msra.gmra.mrb[0].mxu0 %v295_v62  ;;  %632 = vmatmul.mubr.f32.vlgmr.msra.gmra.mrb[0].mxu1 %v303_v63  ;;  %v320_v58 = vld [vmem:[%s2448_s1 + $0xc8] sm:$0xff]  ;;  %v839_v60 = vld [vmem:[%s2451_s4 + $0x78] sm:$0xff]  ;;  %v321_v61 = vld [vmem:[%s2448_s1 + $0xd0] sm:$0xff] }
  0x5e   : > { %589 = vmatprep.mubr.f32.mxu0 %v1660_v0  ;;  %637 = vmatprep.mubr.f32.mxu1 %v1660_v0  ;;  %v322_v62 = vld [vmem:[%s2448_s1 + $0xd8] sm:$0xff]  ;;  %v323_v63 = vld [vmem:[%s2448_s1 + $0xe0] sm:$0xff]  ;;  %v324_v1 = vld [vmem:[%s2448_s1 + $0xe8] sm:$0xff] }
  0x5f   : > { %431 = vperm.xlu0 %1541, %v341_v5   ;;  %v325_v2 = vld [vmem:[%s2448_s1 + $0xf0] sm:$0xff] }
  0x60   : > { %436 = vperm.xlu1 %1542, %v342_v6  }
  0x61   : > { %590 = vmatmul.mubr.f32.gmra.mrb[2].mxu0 %v296_v3  ;;  %638 = vmatmul.mubr.f32.gmra.mrb[2].mxu1 %v304_v4  ;;  %v326_v3 = vld [vmem:[%s2448_s1 + $0xf8] sm:$0xff] }
  0x62   : > { %595 = vmatprep.mubr.f32.mxu0 %v1660_v0  ;;  %643 = vmatprep.mubr.f32.mxu1 %v1660_v0 }
  0x63   : > { %441 = vperm.xlu0 %1541, %v343_v9  }
  0x64   : > { %446 = vperm.xlu1 %1542, %v344_v10  }
  0x65   : > { %596 = vmatmul.mubr.f32.gmra.mrb[4].mxu0 %v297_v7  ;;  %644 = vmatmul.mubr.f32.gmra.mrb[4].mxu1 %v305_v8 }
  0x66   : > { %601 = vmatprep.mubr.f32.mxu0 %v1660_v0  ;;  %649 = vmatprep.mubr.f32.mxu1 %v1660_v0 }
  0x67   : > { %451 = vperm.xlu0 %1541, %v345_v13  }
  0x68   : > { %456 = vperm.xlu1 %1542, %v346_v14  }
  0x69   : > { %602 = vmatmul.mubr.f32.gmra.mrb[6].mxu0 %v298_v11  ;;  %650 = vmatmul.mubr.f32.gmra.mrb[6].mxu1 %v306_v12 }
  0x6a   : > { %607 = vmatprep.mubr.f32.mxu0 %v1660_v0  ;;  %655 = vmatprep.mubr.f32.mxu1 %v1660_v0 }
  0x6b   : > { %461 = vperm.xlu0 %1541, %v347_v17  }
  0x6c   : > { %466 = vperm.xlu1 %1542, %v348_v18  }
  0x6d   : > { %608 = vmatmul.mubr.f32.gmra.mrb[8].mxu0 %v299_v15  ;;  %656 = vmatmul.mubr.f32.gmra.mrb[8].mxu1 %v307_v16 }
  0x6e   : > { %613 = vmatprep.mubr.f32.mxu0 %v1660_v0  ;;  %661 = vmatprep.mubr.f32.mxu1 %v1660_v0 }
  0x6f   : > { %471 = vperm.xlu0 %1541, %v349_v21  }
  0x70   : > { %476 = vperm.xlu1 %1542, %v350_v22  }
  0x71   : > { %614 = vmatmul.mubr.f32.gmra.mrb[10].mxu0 %v300_v19  ;;  %662 = vmatmul.mubr.f32.gmra.mrb[10].mxu1 %v308_v20 }
  0x72   : > { %619 = vmatprep.mubr.f32.mxu0 %v1660_v0  ;;  %667 = vmatprep.mubr.f32.mxu1 %v1660_v0 }
  0x73   : > { %481 = vperm.xlu0 %1541, %v351_v25  }
  0x74   : > { %486 = vperm.xlu1 %1542, %v352_v26  }
  0x75   : > { %620 = vmatmul.mubr.f32.gmra.mrb[12].mxu0 %v301_v23  ;;  %668 = vmatmul.mubr.f32.gmra.mrb[12].mxu1 %v309_v24 }
  0x76   : > { %625 = vmatprep.mubr.f32.mxu0 %v1660_v0  ;;  %673 = vmatprep.mubr.f32.mxu1 %v1660_v0 }
  0x77   : > { %491 = vperm.xlu0 %1541, %v353_v29  }
  0x78   : > { %496 = vperm.xlu1 %1542, %v354_v30  }
  0x79   : > { %626 = vmatmul.mubr.f32.gmra.mrb[14].mxu0 %v302_v27  ;;  %674 = vmatmul.mubr.f32.gmra.mrb[14].mxu1 %v310_v28 }
  0x7a   : > { %679 = vmatprep.mubr.f32.mxu1 %v1660_v0  ;;  %984 = vmatprep.mubr.f32.mxu0 %v1660_v0 }
  0x7b   : > { %501 = vperm.xlu0 %1541, %v355_v32  }
  0x7c   : > { %506 = vperm.xlu1 %1542, %v356_v33  }
  0x7d   : > { %680 = vmatmul.mubr.f32.gmra.mrb[16].mxu1 %v311_v31 }
  0x7e   : > { %685 = vmatprep.mubr.f32.mxu1 %v1660_v0 }
  0x7f   : > { %511 = vperm.xlu0 %1541, %v357_v35  }
  0x80   : > { %516 = vperm.xlu1 %1542, %v358_v36  }
  0x81   : > { %686 = vmatmul.mubr.f32.gmra.mrb[18].mxu1 %v312_v34 }
  0x82   : > { %691 = vmatprep.mubr.f32.mxu1 %v1660_v0 }
  0x83   : > { %842 = vperm.xlu0 %1541, %v824_v38  }
  0x84   : > { %847 = vperm.xlu1 %1542, %v825_v39  }
  0x85   : > { %692 = vmatmul.mubr.f32.gmra.mrb[20].mxu1 %v313_v37 }
  0x86   : > { %697 = vmatprep.mubr.f32.mxu1 %v1660_v0 }
  0x87   : > { %852 = vperm.xlu0 %1541, %v826_v41  }
  0x88   : > { %857 = vperm.xlu1 %1542, %v827_v42  }
  0x89   : > { %698 = vmatmul.mubr.f32.gmra.mrb[22].mxu1 %v314_v40 }
  0x8a   : > { %703 = vmatprep.mubr.f32.mxu1 %v1660_v0 }
  0x8b   : > { %862 = vperm.xlu0 %1541, %v828_v44  }
  0x8c   : > { %867 = vperm.xlu1 %1542, %v829_v45  }
  0x8d   : > { %704 = vmatmul.mubr.f32.gmra.mrb[24].mxu1 %v315_v43 }
  0x8e   : > { %709 = vmatprep.mubr.f32.mxu1 %v1660_v0 }
  0x8f   : > { %872 = vperm.xlu0 %1541, %v830_v47  }
  0x90   : > { %877 = vperm.xlu1 %1542, %v831_v48  }
  0x91   : > { %710 = vmatmul.mubr.f32.gmra.mrb[26].mxu1 %v316_v46 }
  0x92   : > { %715 = vmatprep.mubr.f32.mxu1 %v1660_v0 }
  0x93   : > { %882 = vperm.xlu0 %1541, %v832_v50  }
  0x94   : > { %887 = vperm.xlu1 %1542, %v833_v51  }
  0x95   : > { %716 = vmatmul.mubr.f32.gmra.mrb[28].mxu1 %v317_v49 }
  0x96   : > { %721 = vmatprep.mubr.f32.mxu1 %v1660_v0 }
  0x97   : > { %892 = vperm.xlu0 %1541, %v834_v53  }
  0x98   : > { %897 = vperm.xlu1 %1542, %v835_v54  }
  0x99   : > { %722 = vmatmul.mubr.f32.gmra.mrb[30].mxu1 %v318_v52 }
  0x9a   : > { %727 = vmatprep.mubr.f32.mxu1 %v1660_v0 }
  0x9b   : > { %902 = vperm.xlu0 %1541, %v836_v56  }
  0x9c   : > { %907 = vperm.xlu1 %1542, %v837_v57  }
  0x9d   : > { %728 = vmatmul.mubr.f32.gmra.mrb[32].mxu1 %v319_v55 }
  0x9e   : > { %733 = vmatprep.mubr.f32.mxu1 %v1660_v0 }
  0x9f   : > { %912 = vperm.xlu0 %1541, %v838_v59  }
  0xa0   : > { %917 = vperm.xlu1 %1542, %v839_v60  }
  0xa1   : > { %734 = vmatmul.mubr.f32.gmra.mrb[34].mxu1 %v320_v58 }
  0xa2   : > { %739 = vmatprep.mubr.f32.mxu1 %v1660_v0 }
  0xa5   : > { %740 = vmatmul.mubr.f32.gmra.mrb[36].mxu1 %v321_v61 }
  0xa6   : > { %745 = vmatprep.mubr.f32.mxu1 %v1660_v0 }
  0xa9   : > { %746 = vmatmul.mubr.f32.gmra.mrb[38].mxu1 %v322_v62 }
  0xaa   : > { %751 = vmatprep.mubr.f32.mxu1 %v1660_v0 }
  0xad   : > { %752 = vmatmul.mubr.f32.gmra.mrb[40].mxu1 %v323_v63 }
  0xae   : > { %757 = vmatprep.mubr.f32.mxu1 %v1660_v0 }
  0xb1   : > { %758 = vmatmul.mubr.f32.gmra.mrb[42].mxu1 %v324_v1 }
  0xb2   : > { %763 = vmatprep.mubr.f32.mxu1 %v1660_v0 }
  0xb5   : > { %764 = vmatmul.mubr.f32.gmra.mrb[44].mxu1 %v325_v2 }
  0xb6   : > { %769 = vmatprep.mubr.f32.mxu1 %v1660_v0 }
  0xb9   : > { %770 = vmatmul.mubr.f32.gmra.mrb[46].mxu1 %v326_v3 }
  0xc0   : > { %v362_v4 = vpop.permute.xlu0 %361 }
  0xc3   : > { %v372_v5 = vpop.permute.xlu1 %371 }
  0xc4   : > { %v367_v6 = vpop.permute.xlu0 %366 }
  0xc7   : > { %v377_v7 = vpop.permute.xlu1 %376 }
  0xc8   : > { %v2124_v8 = vpop.permute.xlu0 %381 }
  0xcb   : > { %v2126_v9 = vpop.permute.xlu1 %386 }
  0xcc   : > { %v2128_v10 = vpop.permute.xlu0 %391 }
  0xcf   : > { %v2130_v11 = vpop.permute.xlu1 %396 }
  0xd0   : > { %v402_v12 = vpop.permute.xlu0 %401 }
  0xd3   : > { %v407_v19 = vpop.permute.xlu1 %406 }
  0xd4   : > { %v412_v32 = vpop.permute.xlu0 %411 }
  0xd7   : > { %v417_v49 = vpop.permute.xlu1 %416 }
 0x130   : > { %v585_v13 = vpop.f32.mrb[0].mxu0  ;;  %v633_v14 = vpop.f32.mrb[0].mxu1 }
 0x131   : > { %v587_v15 = vpop.f32.mrb[1].mxu0  ;;  %v634_v16 = vadd.f32 %v633_v14, %v402_v12  ;;  %v635_v17 = vpop.f32.mrb[1].mxu1  ;;  %v586_v20 = vadd.f32 %v585_v13, %v362_v4 }
 0x132   : > { %v636_v18 = vadd.f32 %v635_v17, %v402_v12  ;;  %v588_v21 = vadd.f32 %v587_v15, %v362_v4 }
 0x133   : > { %v792_v26 = vmax.f32 %v634_v16, 0.0  ;;  %v776_v33 = vmax.f32 %v586_v20, 0.0  ;;  %v422_v16 = vpop.permute.xlu0 %421 }
 0x134   : > { %v591_v22 = vpop.f32.mrb[2].mxu0  ;;  %v639_v23 = vpop.f32.mrb[2].mxu1  ;;  %v793_v30 = vmax.f32 %v636_v18, 0.0  ;;  %v777_v36 = vmax.f32 %v588_v21, 0.0 }
 0x135   : > { %v592_v24 = vadd.f32 %v591_v22, %v367_v6  ;;  %v593_v25 = vpop.f32.mrb[3].mxu0  ;;  %v640_v27 = vadd.f32 %v639_v23, %v407_v19  ;;  %v641_v28 = vpop.f32.mrb[3].mxu1 }
 0x136   : > { %v594_v29 = vadd.f32 %v593_v25, %v367_v6  ;;  %v642_v31 = vadd.f32 %v641_v28, %v407_v19  ;;  %v427_v19 = vpop.permute.xlu1 %426 }
 0x137   : > { %v778_v34 = vmax.f32 %v592_v24, 0.0  ;;  %v794_v35 = vmax.f32 %v640_v27, 0.0 }
 0x138   : > { %v779_v37 = vmax.f32 %v594_v29, 0.0  ;;  %v597_v38 = vpop.f32.mrb[4].mxu0  ;;  %v795_v39 = vmax.f32 %v642_v31, 0.0  ;;  %v645_v40 = vpop.f32.mrb[4].mxu1 }
 0x139   : > { %v1331_v41 = vpack.c.bf16 %v778_v34, %v776_v33  ;;  %v2132_v42 = vpack.c.bf16 %v794_v35, %v792_v26  ;;  %v599_v43 = vpop.f32.mrb[5].mxu0  ;;  %v646_v44 = vadd.f32 %v645_v40, %v412_v32  ;;  %v647_v45 = vpop.f32.mrb[5].mxu1  ;;  %v598_v50 = vadd.f32 %v597_v38, %v372_v5 }
 0x13a   : > { %v1329_v46 = vpack.c.bf16 %v779_v37, %v777_v36  ;;  %v2134_v47 = vpack.c.bf16 %v795_v39, %v793_v30  ;;  %v648_v48 = vadd.f32 %v647_v45, %v412_v32  ;;  %v600_v51 = vadd.f32 %v599_v43, %v372_v5  ;;  %v432_v45 = vpop.permute.xlu0 %431 }
 0x13b   : > { %v796_v54 = vmax.f32 %v646_v44, 0.0  ;;  %v780_v62 = vmax.f32 %v598_v50, 0.0 }
 0x13c   : > { %v603_v52 = vpop.f32.mrb[6].mxu0  ;;  %v651_v53 = vpop.f32.mrb[6].mxu1  ;;  %1330 = vmatprep.subr.bf16.mxu0 %v1329_v46  ;;  %v797_v59 = vmax.f32 %v648_v48, 0.0  ;;  %v781_v2 = vmax.f32 %v600_v51, 0.0 }
 0x13d   : > { %v604_v55 = vadd.f32 %v603_v52, %v377_v7  ;;  %v652_v56 = vadd.f32 %v651_v53, %v417_v49  ;;  %v605_v57 = vpop.f32.mrb[7].mxu0  ;;  %v653_v58 = vpop.f32.mrb[7].mxu1  ;;  %1332 = vmatpush1.bf16.msra.mxu0 %v1331_v41 }
 0x13e   : > { %v606_v60 = vadd.f32 %v605_v57, %v377_v7  ;;  %v654_v61 = vadd.f32 %v653_v58, %v417_v49  ;;  %v437_v49 = vpop.permute.xlu1 %436 }
 0x13f   : > { %v782_v63 = vmax.f32 %v604_v55, 0.0  ;;  %v798_v1 = vmax.f32 %v652_v56, 0.0 }
 0x140   : > { %v783_v3 = vmax.f32 %v606_v60, 0.0  ;;  %v799_v4 = vmax.f32 %v654_v61, 0.0  ;;  %v609_v6 = vpop.f32.mrb[8].mxu0  ;;  %v657_v5 = vpop.f32.mrb[8].mxu1 }
 0x141   : > { %v1335_v12 = vpack.c.bf16 %v782_v63, %v780_v62  ;;  %v2136_v13 = vpack.c.bf16 %v798_v1, %v796_v54  ;;  %v611_v14 = vpop.f32.mrb[9].mxu0  ;;  %v659_v15 = vpop.f32.mrb[9].mxu1  ;;  %v610_v7 = vadd.f32 %v609_v6, %v2124_v8  ;;  %v658_v20 = vadd.f32 %v657_v5, %v422_v16 }
 0x142   : > { %v1333_v17 = vpack.c.bf16 %v783_v3, %v781_v2  ;;  %v2138_v18 = vpack.c.bf16 %v799_v4, %v797_v59  ;;  %v612_v21 = vadd.f32 %v611_v14, %v2124_v8  ;;  %v660_v22 = vadd.f32 %v659_v15, %v422_v16 }
 0x143   : > { %v784_v31 = vmax.f32 %v610_v7, 0.0  ;;  %v800_v32 = vmax.f32 %v658_v20, 0.0 }
 0x144   : > { %v615_v23 = vpop.f32.mrb[10].mxu0  ;;  %v663_v24 = vpop.f32.mrb[10].mxu1  ;;  %1334 = vmatprep.subr.bf16.mxu0 %v1333_v17  ;;  %v785_v35 = vmax.f32 %v612_v21, 0.0  ;;  %v801_v36 = vmax.f32 %v660_v22, 0.0 }
 0x145   : > { %v616_v25 = vadd.f32 %v615_v23, %v2126_v9  ;;  %v664_v26 = vadd.f32 %v663_v24, %v427_v19  ;;  %v617_v27 = vpop.f32.mrb[11].mxu0  ;;  %v665_v28 = vpop.f32.mrb[11].mxu1  ;;  %1336 = vmatpush1.bf16.msra.mxu0 %v1335_v12 }
 0x146   : > { %v618_v29 = vadd.f32 %v617_v27, %v2126_v9  ;;  %v666_v30 = vadd.f32 %v665_v28, %v427_v19  ;;  %v810_v28 = vld [vmem:[%s2450_s3 + $0x10] sm:$0xff] }
 0x147   : > { %v786_v33 = vmax.f32 %v616_v25, 0.0  ;;  %v802_v34 = vmax.f32 %v664_v26, 0.0  ;;  %v809_v25 = vld [vmem:[%s2450_s3 + $0x8] sm:$0xff] }
 0x148   : > { %v787_v8 = vmax.f32 %v618_v29, 0.0  ;;  %v803_v37 = vmax.f32 %v666_v30, 0.0  ;;  %v621_v38 = vpop.f32.mrb[12].mxu0  ;;  %v669_v39 = vpop.f32.mrb[12].mxu1 }
 0x149   : > { %v1339_v40 = vpack.c.bf16 %v786_v33, %v784_v31  ;;  %v1355_v41 = vpack.c.bf16 %v802_v34, %v800_v32  ;;  %v623_v43 = vpop.f32.mrb[13].mxu0  ;;  %v671_v44 = vpop.f32.mrb[13].mxu1  ;;  %v622_v9 = vadd.f32 %v621_v38, %v2128_v10  ;;  %v670_v50 = vadd.f32 %v669_v39, %v432_v45  ;;  %v811_v31 = vld [vmem:[%s2450_s3 + $0x18] sm:$0xff]  ;;  %v812_v34 = vld [vmem:[%s2450_s3 + $0x20] sm:$0xff]  ;;  %v814_v39 = vld [vmem:[%s2450_s3 + $0x30] sm:$0xff] }
 0x14a   : > { %v1337_v46 = vpack.c.bf16 %v787_v8, %v785_v35  ;;  %v1353_v48 = vpack.c.bf16 %v803_v37, %v801_v36  ;;  %v624_v51 = vadd.f32 %v623_v43, %v2128_v10  ;;  %v672_v52 = vadd.f32 %v671_v44, %v432_v45  ;;  %v813_v8 = vld [vmem:[%s2450_s3 + $0x28] sm:$0xff]  ;;  %v815_v43 = vld [vmem:[%s2450_s3 + $0x38] sm:$0xff] }
 0x14b   : > { %v788_v61 = vmax.f32 %v622_v9, 0.0  ;;  %v804_v62 = vmax.f32 %v670_v50, 0.0  ;;  %v817_v9 = vld [vmem:[%s2450_s3 + $0x48] sm:$0xff] }
 0x14c   : > { %v627_v53 = vpop.f32.mrb[14].mxu0  ;;  %v675_v54 = vpop.f32.mrb[14].mxu1  ;;  %1338 = vmatprep.subr.bf16.mxu0 %v1337_v46  ;;  %v789_v2 = vmax.f32 %v624_v51, 0.0  ;;  %v805_v3 = vmax.f32 %v672_v52, 0.0  ;;  %v816_v46 = vld [vmem:[%s2450_s3 + $0x40] sm:$0xff]  ;;  %v818_v52 = vld [vmem:[%s2450_s3 + $0x50] sm:$0xff] }
 0x14d   : > { %v628_v55 = vadd.f32 %v627_v53, %v2130_v11  ;;  %v676_v56 = vadd.f32 %v675_v54, %v437_v49  ;;  %v629_v57 = vpop.f32.mrb[15].mxu0  ;;  %v677_v58 = vpop.f32.mrb[15].mxu1  ;;  %1340 = vmatpush1.bf16.msra.mxu0 %v1339_v40  ;;  %v819_v53 = vld [vmem:[%s2450_s3 + $0x58] sm:$0xff]  ;;  %v820_v54 = vld [vmem:[%s2450_s3 + $0x60] sm:$0xff] }
 0x14e   : > { %v630_v59 = vadd.f32 %v629_v57, %v2130_v11  ;;  %v678_v60 = vadd.f32 %v677_v58, %v437_v49  ;;  %v823_v57 = vld [vmem:[%s2450_s3 + $0x78] sm:$0xff]  ;;  %v442_v58 = vpop.permute.xlu0 %441 }
 0x14f   : > { %v790_v63 = vmax.f32 %v628_v55, 0.0  ;;  %v806_v1 = vmax.f32 %v676_v56, 0.0  ;;  %v821_v55 = vld [vmem:[%s2450_s3 + $0x68] sm:$0xff]  ;;  %v822_v56 = vld [vmem:[%s2450_s3 + $0x70] sm:$0xff] }
 0x150   : > { %v791_v10 = vmax.f32 %v630_v59, 0.0  ;;  %v807_v4 = vmax.f32 %v678_v60, 0.0  ;;  %v2148_v6 = vpop.f32.mrb[16].mxu1  ;;  %v447_v59 = vpop.permute.xlu1 %446 }
 0x151   : > { %v1343_v5 = vpack.c.bf16 %v790_v63, %v788_v61  ;;  %v1359_v12 = vpack.c.bf16 %v806_v1, %v804_v62  ;;  %v2150_v14 = vpop.f32.mrb[17].mxu1 }
 0x152   : > { %v1341_v15 = vpack.c.bf16 %v791_v10, %v789_v2  ;;  %v1357_v16 = vpack.c.bf16 %v807_v4, %v805_v3  ;;  %v452_v60 = vpop.permute.xlu0 %451 }
 0x154   : > { %v2152_v17 = vpop.f32.mrb[18].mxu1  ;;  %1342 = vmatprep.subr.bf16.mxu0 %v1341_v15  ;;  %v457_v61 = vpop.permute.xlu1 %456 }
 0x155   : > { %v2154_v11 = vpop.f32.mrb[19].mxu1  ;;  %1344 = vmatpush1.bf16.msra.mxu0 %v1343_v5 }
 0x156   : > { %1346 = vmatprep.subr.bf16.mxu0 %v2134_v47  ;;  %v462_v62 = vpop.permute.xlu0 %461 }
 0x158   : > { %v2157_v19 = vpop.f32.mrb[20].mxu1  ;;  %v2279_v63 = vpop.permute.xlu1 %466 }
 0x159   : > { %v2159_v7 = vpop.f32.mrb[21].mxu1  ;;  %1348 = vmatpush1.bf16.msra.mxu0 %v2132_v42  ;;  %v808_v42 = vld [vmem:[%s2450_s3] sm:$0xff] }
 0x15a   : > { %1350 = vmatprep.subr.bf16.mxu0 %v2138_v18  ;;  %v2281_v1 = vpop.permute.xlu0 %471 }
 0x15c   : > { %v2163_v20 = vpop.f32.mrb[22].mxu1  ;;  %v2283_v2 = vpop.permute.xlu1 %476 }
 0x15d   : > { %v2165_v21 = vpop.f32.mrb[23].mxu1  ;;  %1352 = vmatpush1.bf16.msra.mxu0 %v2136_v13 }
 0x15e   : > { %1354 = vmatprep.subr.bf16.mxu0 %v1353_v48  ;;  %v2285_v3 = vpop.permute.xlu0 %481 }
 0x160   : > { %v2168_v22 = vpop.f32.mrb[24].mxu1  ;;  %v2287_v10 = vpop.permute.xlu1 %486 }
 0x161   : > { %v2170_v23 = vpop.f32.mrb[25].mxu1  ;;  %1356 = vmatpush1.bf16.msra.mxu0 %v1355_v41 }
 0x162   : > { %1358 = vmatprep.subr.bf16.mxu0 %v1357_v16  ;;  %v682_v16 = vadd.f32 %v2148_v6, %v442_v58 }
 0x164   : > { %v2172_v47 = vpop.f32.mrb[26].mxu1  ;;  %v2291_v4 = vpop.permute.xlu1 %496 }
 0x165   : > { %v2174_v24 = vpop.f32.mrb[27].mxu1  ;;  %1360 = vmatpush1.bf16.msra.mxu0 %v1359_v12 }
 0x168   : > { %v2179_v18 = vpop.f32.mrb[28].mxu1  ;;  %985 = vmatmul.mubr.f32.vlgmr.msra.gmra.mrb[16].mxu0 %v808_v42  ;;  %v2295_v12 = vpop.permute.xlu1 %506 }
 0x169   : > { %v2181_v13 = vpop.f32.mrb[29].mxu1  ;;  %990 = vmatprep.mubr.f32.mxu0 %v1660_v0 }
 0x16c   : > { %v2187_v26 = vpop.f32.mrb[30].mxu1  ;;  %991 = vmatmul.mubr.f32.gmra.mrb[18].mxu0 %v809_v25  ;;  %v2300_v42 = vpop.permute.xlu1 %516  ;;  %v684_v25 = vadd.f32 %v2150_v14, %v442_v58 }
 0x16d   : > { %v2189_v27 = vpop.f32.mrb[31].mxu1  ;;  %996 = vmatprep.mubr.f32.mxu0 %v1660_v0 }
 0x170   : > { %v2195_v29 = vpop.f32.mrb[32].mxu1  ;;  %997 = vmatmul.mubr.f32.gmra.mrb[20].mxu0 %v810_v28 }
 0x171   : > { %v2197_v30 = vpop.f32.mrb[33].mxu1  ;;  %1002 = vmatprep.mubr.f32.mxu0 %v1660_v0 }
 0x174   : > { %v2203_v32 = vpop.f32.mrb[34].mxu1  ;;  %1003 = vmatmul.mubr.f32.gmra.mrb[22].mxu0 %v811_v31  ;;  %v688_v31 = vadd.f32 %v2152_v17, %v447_v59 }
 0x175   : > { %v2205_v33 = vpop.f32.mrb[35].mxu1  ;;  %1008 = vmatprep.mubr.f32.mxu0 %v1660_v0 }
 0x178   : > { %v2211_v35 = vpop.f32.mrb[36].mxu1  ;;  %1009 = vmatmul.mubr.f32.gmra.mrb[24].mxu0 %v812_v34 }
 0x179   : > { %v2213_v36 = vpop.f32.mrb[37].mxu1  ;;  %1014 = vmatprep.mubr.f32.mxu0 %v1660_v0 }
 0x17c   : > { %v2219_v37 = vpop.f32.mrb[38].mxu1  ;;  %1015 = vmatmul.mubr.f32.gmra.mrb[26].mxu0 %v813_v8  ;;  %v690_v8 = vadd.f32 %v2154_v11, %v447_v59 }
 0x17d   : > { %v2221_v38 = vpop.f32.mrb[39].mxu1  ;;  %1020 = vmatprep.mubr.f32.mxu0 %v1660_v0 }
 0x180   : > { %v2227_v40 = vpop.f32.mrb[40].mxu1  ;;  %1021 = vmatmul.mubr.f32.gmra.mrb[28].mxu0 %v814_v39 }
 0x181   : > { %v2229_v41 = vpop.f32.mrb[41].mxu1  ;;  %1026 = vmatprep.mubr.f32.mxu0 %v1660_v0 }
 0x184   : > { %v2235_v44 = vpop.f32.mrb[42].mxu1  ;;  %1027 = vmatmul.mubr.f32.gmra.mrb[30].mxu0 %v815_v43 }
 0x185   : > { %v2237_v45 = vpop.f32.mrb[43].mxu1  ;;  %1032 = vmatprep.mubr.f32.mxu0 %v1660_v0 }
 0x188   : > { %v2243_v48 = vpop.f32.mrb[44].mxu1  ;;  %1033 = vmatmul.mubr.f32.gmra.mrb[32].mxu0 %v816_v46 }
 0x189   : > { %v2245_v49 = vpop.f32.mrb[45].mxu1  ;;  %1038 = vmatprep.mubr.f32.mxu0 %v1660_v0 }
 0x18c   : > { %v2251_v50 = vpop.f32.mrb[46].mxu1  ;;  %1039 = vmatmul.mubr.f32.gmra.mrb[34].mxu0 %v817_v9 }
 0x18d   : > { %v2253_v51 = vpop.f32.mrb[47].mxu1  ;;  %1044 = vmatprep.mubr.f32.mxu0 %v1660_v0 }
 0x190   : > { %1045 = vmatmul.mubr.f32.gmra.mrb[36].mxu0 %v818_v52  ;;  %v848_v52 = vpop.permute.xlu1 %847 }
 0x191   : > { %1050 = vmatprep.mubr.f32.mxu0 %v1660_v0  ;;  %v1387_v58 = vadd.f32 %v848_v52, %v690_v8 }
 0x194   : > { %1051 = vmatmul.mubr.f32.gmra.mrb[38].mxu0 %v819_v53 }
 0x195   : > { %1056 = vmatprep.mubr.f32.mxu0 %v1660_v0 }
 0x198   : > { %1057 = vmatmul.mubr.f32.gmra.mrb[40].mxu0 %v820_v54  ;;  %v694_v54 = vadd.f32 %v2157_v19, %v452_v60 }
 0x199   : > { %1062 = vmatprep.mubr.f32.mxu0 %v1660_v0 }
 0x19c   : > { %1063 = vmatmul.mubr.f32.gmra.mrb[42].mxu0 %v821_v55  ;;  %v1384_v55 = vadd.f32 %v848_v52, %v688_v31 }
 0x19d   : > { %1068 = vmatprep.mubr.f32.mxu0 %v1660_v0 }
 0x1a0   : > { %1069 = vmatmul.mubr.f32.gmra.mrb[44].mxu0 %v822_v56  ;;  %v696_v56 = vadd.f32 %v2159_v7, %v452_v60  ;;  %v702_v60 = vadd.f32 %v2165_v21, %v457_v61 }
 0x1a1   : > { %1074 = vmatprep.mubr.f32.mxu0 %v1660_v0  ;;  %v2289_v0 = vpop.permute.xlu0 %491 }
 0x1a4   : > { %1075 = vmatmul.mubr.f32.gmra.mrb[46].mxu0 %v823_v57 }
 0x1a5   : > { %v2293_v5 = vpop.permute.xlu0 %501 }
 0x1a9   : > { %v2297_v15 = vpop.permute.xlu0 %511 }
 0x1ad   : > { %v843_v28 = vpop.permute.xlu0 %842 }
 0x1ae   : > { %v1378_v34 = vadd.f32 %v843_v28, %v682_v16  ;;  %v1381_v43 = vadd.f32 %v843_v28, %v684_v25  ;;  %v700_v16 = vadd.f32 %v2163_v20, %v457_v61  ;;  %v708_v20 = vadd.f32 %v2170_v23, %v462_v62 }
 0x1b1   : > { %v853_v59 = vpop.permute.xlu0 %852 }
 0x1b2   : > { %v1390_v7 = vadd.f32 %v853_v59, %v694_v54 }
 0x23b   : > { %v986_v39 = vpop.f32.mrb[16].mxu0 }
 0x23c   : > { %v1379_v46 = vadd.f32 %v1378_v34, %v986_v39  ;;  %v988_v9 = vpop.f32.mrb[17].mxu0  ;;  %v1393_v34 = vadd.f32 %v853_v59, %v696_v56  ;;  %v863_v56 = vpop.permute.xlu0 %862 }
 0x23d   : > { %v1382_v53 = vadd.f32 %v1381_v43, %v988_v9  ;;  %v858_v43 = vpop.permute.xlu1 %857  ;;  %v706_v9 = vadd.f32 %v2168_v22, %v462_v62 }
 0x23e   : > { %v1113_v6 = vmax.f32 %v1379_v46, 0.0  ;;  %v1399_v61 = vadd.f32 %v858_v43, %v702_v60 }
 0x23f   : > { %v1114_v14 = vmax.f32 %v1382_v53, 0.0  ;;  %v992_v57 = vpop.f32.mrb[18].mxu0  ;;  %v1396_v53 = vadd.f32 %v858_v43, %v700_v16  ;;  %v1402_v22 = vadd.f32 %v863_v56, %v706_v9 }
 0x240   : > { %1145 = vst [vmem:[%s2309_s27] sm:$0xff] %v1113_v6  ;;  %v1385_v17 = vadd.f32 %v1384_v55, %v992_v57  ;;  %v994_v11 = vpop.f32.mrb[19].mxu0  ;;  %v712_v57 = vadd.f32 %v2172_v47, %v2279_v63 }
 0x241   : > { %1146 = vst [vmem:[%s2309_s27 + $0x8] sm:$0xff] %v1114_v14  ;;  %v1388_v19 = vadd.f32 %v1387_v58, %v994_v11  ;;  %v1405_v11 = vadd.f32 %v863_v56, %v708_v20  ;;  %v868_v16 = vpop.permute.xlu1 %867  ;;  %v732_v56 = vadd.f32 %v2197_v30, %v2285_v3 }
 0x242   : > { %v1115_v25 = vmax.f32 %v1385_v17, 0.0  ;;  %v714_v17 = vadd.f32 %v2174_v24, %v2279_v63  ;;  %v1408_v60 = vadd.f32 %v868_v16, %v712_v57 }
 0x243   : > { %v1116_v28 = vmax.f32 %v1388_v19, 0.0  ;;  %v998_v31 = vpop.f32.mrb[20].mxu0 }
 0x244   : > { %1147 = vst [vmem:[%s2309_s27 + $0x10] sm:$0xff] %v1115_v25  ;;  %v1391_v8 = vadd.f32 %v1390_v7, %v998_v31  ;;  %v1000_v39 = vpop.f32.mrb[21].mxu0  ;;  %v718_v7 = vadd.f32 %v2179_v18, %v2281_v1  ;;  %v1411_v31 = vadd.f32 %v868_v16, %v714_v17 }
 0x245   : > { %1148 = vst [vmem:[%s2309_s27 + $0x18] sm:$0xff] %v1116_v28  ;;  %v1394_v46 = vadd.f32 %v1393_v34, %v1000_v39  ;;  %v720_v28 = vadd.f32 %v2181_v13, %v2281_v1  ;;  %v873_v39 = vpop.permute.xlu0 %872 }
 0x246   : > { %v1117_v52 = vmax.f32 %v1391_v8, 0.0  ;;  %v1414_v9 = vadd.f32 %v873_v39, %v718_v7 }
 0x247   : > { %v1118_v54 = vmax.f32 %v1394_v46, 0.0  ;;  %v1004_v21 = vpop.f32.mrb[22].mxu0  ;;  %v724_v46 = vadd.f32 %v2187_v26, %v2283_v2 }
 0x248   : > { %1149 = vst [vmem:[%s2309_s27 + $0x20] sm:$0xff] %v1117_v52  ;;  %v1397_v6 = vadd.f32 %v1396_v53, %v1004_v21  ;;  %v1006_v55 = vpop.f32.mrb[23].mxu0  ;;  %v726_v52 = vadd.f32 %v2189_v27, %v2283_v2  ;;  %v1417_v53 = vadd.f32 %v873_v39, %v720_v28  ;;  %v878_v21 = vpop.permute.xlu1 %877  ;;  %v744_v28 = vadd.f32 %v2213_v36, %v2289_v0 }
 0x249   : > { %1150 = vst [vmem:[%s2309_s27 + $0x28] sm:$0xff] %v1118_v54  ;;  %v1400_v14 = vadd.f32 %v1399_v61, %v1006_v55  ;;  %v1420_v55 = vadd.f32 %v878_v21, %v724_v46  ;;  %v748_v39 = vadd.f32 %v2219_v37, %v2291_v4  ;;  %v750_v46 = vadd.f32 %v2221_v38, %v2291_v4 }
 0x24a   : > { %v1119_v58 = vmax.f32 %v1397_v6, 0.0  ;;  %v730_v6 = vadd.f32 %v2195_v29, %v2285_v3 }
 0x24b   : > { %v1120_v23 = vmax.f32 %v1400_v14, 0.0  ;;  %v1010_v62 = vpop.f32.mrb[24].mxu0  ;;  %v1423_v14 = vadd.f32 %v878_v21, %v726_v52 }
 0x24c   : > { %1151 = vst [vmem:[%s2309_s27 + $0x30] sm:$0xff] %v1119_v58  ;;  %v1403_v59 = vadd.f32 %v1402_v22, %v1010_v62  ;;  %v1012_v19 = vpop.f32.mrb[25].mxu0  ;;  %v883_v22 = vpop.permute.xlu0 %882 }
 0x24d   : > { %1152 = vst [vmem:[%s2309_s27 + $0x38] sm:$0xff] %v1120_v23  ;;  %v1406_v25 = vadd.f32 %v1405_v11, %v1012_v19  ;;  %v736_v23 = vadd.f32 %v2203_v32, %v2287_v10  ;;  %v1426_v62 = vadd.f32 %v883_v22, %v730_v6  ;;  %v738_v11 = vadd.f32 %v2205_v33, %v2287_v10 }
 0x24e   : > { %v1121_v47 = vmax.f32 %v1403_v59, 0.0  ;;  %v1429_v59 = vadd.f32 %v883_v22, %v732_v56  ;;  %v760_v56 = vadd.f32 %v2235_v44, %v2295_v12 }
 0x24f   : > { %v1122_v24 = vmax.f32 %v1406_v25, 0.0  ;;  %v1016_v63 = vpop.f32.mrb[26].mxu0  ;;  %v888_v25 = vpop.permute.xlu1 %887 }
 0x250   : > { %1153 = vst [vmem:[%s2309_s27 + $0x40] sm:$0xff] %v1121_v47  ;;  %v1409_v34 = vadd.f32 %v1408_v60, %v1016_v63  ;;  %v1018_v8 = vpop.f32.mrb[27].mxu0  ;;  %v742_v47 = vadd.f32 %v2211_v35, %v2289_v0  ;;  %v1432_v60 = vadd.f32 %v888_v25, %v736_v23  ;;  %v766_v23 = vadd.f32 %v2243_v48, %v2297_v15 }
 0x251   : > { %1154 = vst [vmem:[%s2309_s27 + $0x48] sm:$0xff] %v1122_v24  ;;  %v1412_v43 = vadd.f32 %v1411_v31, %v1018_v8  ;;  %v1435_v24 = vadd.f32 %v888_v25, %v738_v11 }
 0x252   : > { %v1123_v18 = vmax.f32 %v1409_v34, 0.0  ;;  %v893_v34 = vpop.permute.xlu0 %892 }
 0x253   : > { %v1124_v13 = vmax.f32 %v1412_v43, 0.0  ;;  %v1022_v1 = vpop.f32.mrb[28].mxu0  ;;  %v1438_v43 = vadd.f32 %v893_v34, %v742_v47 }
 0x254   : > { %1155 = vst [vmem:[%s2309_s27 + $0x50] sm:$0xff] %v1123_v18  ;;  %v1415_v20 = vadd.f32 %v1414_v9, %v1022_v1  ;;  %v1024_v54 = vpop.f32.mrb[29].mxu0  ;;  %v1441_v18 = vadd.f32 %v893_v34, %v744_v28 }
 0x255   : > { %1156 = vst [vmem:[%s2309_s27 + $0x58] sm:$0xff] %v1124_v13  ;;  %v1418_v61 = vadd.f32 %v1417_v53, %v1024_v54  ;;  %v898_v13 = vpop.permute.xlu1 %897  ;;  %v754_v53 = vadd.f32 %v2227_v40, %v2293_v5  ;;  %v756_v54 = vadd.f32 %v2229_v41, %v2293_v5 }
 0x256   : > { %v1125_v26 = vmax.f32 %v1415_v20, 0.0  ;;  %v1444_v20 = vadd.f32 %v898_v13, %v748_v39  ;;  %v1447_v21 = vadd.f32 %v898_v13, %v750_v46 }
 0x257   : > { %v1126_v27 = vmax.f32 %v1418_v61, 0.0  ;;  %v1028_v2 = vpop.f32.mrb[30].mxu0 }
 0x258   : > { %1157 = vst [vmem:[%s2309_s27 + $0x60] sm:$0xff] %v1125_v26  ;;  %v1421_v57 = vadd.f32 %v1420_v55, %v1028_v2  ;;  %v1030_v58 = vpop.f32.mrb[31].mxu0  ;;  %v903_v26 = vpop.permute.xlu0 %902  ;;  %v762_v2 = vadd.f32 %v2237_v45, %v2295_v12 }
 0x259   : > { %1158 = vst [vmem:[%s2309_s27 + $0x68] sm:$0xff] %v1126_v27  ;;  %v1424_v17 = vadd.f32 %v1423_v14, %v1030_v58  ;;  %v1450_v27 = vadd.f32 %v903_v26, %v754_v53  ;;  %v1453_v14 = vadd.f32 %v903_v26, %v756_v54  ;;  %v908_v22 = vpop.permute.xlu1 %907 }
 0x25a   : > { %v1127_v29 = vmax.f32 %v1421_v57, 0.0  ;;  %v1459_v11 = vadd.f32 %v908_v22, %v762_v2 }
 0x25b   : > { %v1128_v30 = vmax.f32 %v1424_v17, 0.0  ;;  %v1034_v3 = vpop.f32.mrb[32].mxu0 }
 0x25c   : > { %1159 = vst [vmem:[%s2309_s27 + $0x70] sm:$0xff] %v1127_v29  ;;  %v1427_v19 = vadd.f32 %v1426_v62, %v1034_v3  ;;  %v1036_v16 = vpop.f32.mrb[33].mxu0  ;;  %v1456_v29 = vadd.f32 %v908_v22, %v760_v56  ;;  %v768_v62 = vadd.f32 %v2245_v49, %v2297_v15  ;;  %v774_v49 = vadd.f32 %v2253_v51, %v2300_v42 }
 0x25d   : > { %1160 = vst [vmem:[%s2309_s27 + $0x78] sm:$0xff] %v1128_v30  ;;  %v1430_v7 = vadd.f32 %v1429_v59, %v1036_v16  ;;  %v913_v59 = vpop.permute.xlu0 %912  ;;  %v772_v16 = vadd.f32 %v2251_v50, %v2300_v42  ;;  %v918_v28 = vpop.permute.xlu1 %917 }
 0x25e   : > { %v1129_v32 = vmax.f32 %v1427_v19, 0.0  ;;  %v1462_v25 = vadd.f32 %v913_v59, %v766_v23  ;;  %v1465_v47 = vadd.f32 %v913_v59, %v768_v62  ;;  %v1471_v51 = vadd.f32 %v918_v28, %v774_v49 }
 0x25f   : > { %v1130_v33 = vmax.f32 %v1430_v7, 0.0  ;;  %v1040_v10 = vpop.f32.mrb[34].mxu0  ;;  %v1468_v50 = vadd.f32 %v918_v28, %v772_v16 }
 0x260   : > { %1161 = vst [vmem:[%s2309_s27 + $0x80] sm:$0xff] %v1129_v32  ;;  %v1433_v63 = vadd.f32 %v1432_v60, %v1040_v10  ;;  %v1042_v31 = vpop.f32.mrb[35].mxu0 }
 0x261   : > { %1162 = vst [vmem:[%s2309_s27 + $0x88] sm:$0xff] %v1130_v33  ;;  %v1436_v8 = vadd.f32 %v1435_v24, %v1042_v31 }
 0x262   : > { %v1131_v35 = vmax.f32 %v1433_v63, 0.0 }
 0x263   : > { %v1132_v36 = vmax.f32 %v1436_v8, 0.0  ;;  %v1046_v0 = vpop.f32.mrb[36].mxu0 }
 0x264   : > { %1163 = vst [vmem:[%s2309_s27 + $0x90] sm:$0xff] %v1131_v35  ;;  %v1439_v9 = vadd.f32 %v1438_v43, %v1046_v0  ;;  %v1048_v52 = vpop.f32.mrb[37].mxu0 }
 0x265   : > { %1164 = vst [vmem:[%s2309_s27 + $0x98] sm:$0xff] %v1132_v36  ;;  %v1442_v1 = vadd.f32 %v1441_v18, %v1048_v52 }
 0x266   : > { %v1133_v37 = vmax.f32 %v1439_v9, 0.0 }
 0x267   : > { %v1134_v38 = vmax.f32 %v1442_v1, 0.0  ;;  %v1052_v4 = vpop.f32.mrb[38].mxu0 }
 0x268   : > { %1165 = vst [vmem:[%s2309_s27 + $0xa0] sm:$0xff] %v1133_v37  ;;  %v1445_v61 = vadd.f32 %v1444_v20, %v1052_v4  ;;  %v1054_v6 = vpop.f32.mrb[39].mxu0 }
 0x269   : > { %1166 = vst [vmem:[%s2309_s27 + $0xa8] sm:$0xff] %v1134_v38  ;;  %v1448_v55 = vadd.f32 %v1447_v21, %v1054_v6 }
 0x26a   : > { %v1135_v40 = vmax.f32 %v1445_v61, 0.0 }
 0x26b   : > { %v1136_v41 = vmax.f32 %v1448_v55, 0.0  ;;  %v1058_v5 = vpop.f32.mrb[40].mxu0 }
 0x26c   : > { %1167 = vst [vmem:[%s2309_s27 + $0xb0] sm:$0xff] %v1135_v40  ;;  %v1451_v57 = vadd.f32 %v1450_v27, %v1058_v5  ;;  %v1060_v58 = vpop.f32.mrb[41].mxu0 }
 0x26d   : > { %1168 = vst [vmem:[%s2309_s27 + $0xb8] sm:$0xff] %v1136_v41  ;;  %v1454_v17 = vadd.f32 %v1453_v14, %v1060_v58 }
 0x26e   : > { %v1137_v44 = vmax.f32 %v1451_v57, 0.0 }
 0x26f   : > { %v1138_v45 = vmax.f32 %v1454_v17, 0.0  ;;  %v1064_v12 = vpop.f32.mrb[42].mxu0 }
 0x270   : > { %1169 = vst [vmem:[%s2309_s27 + $0xc0] sm:$0xff] %v1137_v44  ;;  %v1457_v30 = vadd.f32 %v1456_v29, %v1064_v12  ;;  %v1066_v3 = vpop.f32.mrb[43].mxu0 }
 0x271   : > { %1170 = vst [vmem:[%s2309_s27 + $0xc8] sm:$0xff] %v1138_v45  ;;  %v1460_v19 = vadd.f32 %v1459_v11, %v1066_v3 }
 0x272   : > { %v1139_v48 = vmax.f32 %v1457_v30, 0.0 }
 0x273   : > { %v1140_v15 = vmax.f32 %v1460_v19, 0.0  ;;  %v1070_v7 = vpop.f32.mrb[44].mxu0 }
 0x274   : > { %1171 = vst [vmem:[%s2309_s27 + $0xd0] sm:$0xff] %v1139_v48  ;;  %v1463_v32 = vadd.f32 %v1462_v25, %v1070_v7  ;;  %v1072_v60 = vpop.f32.mrb[45].mxu0 }
 0x275   : > { %1172 = vst [vmem:[%s2309_s27 + $0xd8] sm:$0xff] %v1140_v15  ;;  %v1466_v33 = vadd.f32 %v1465_v47, %v1072_v60 }
 0x276   : > { %v1141_v10 = vmax.f32 %v1463_v32, 0.0 }
 0x277   : > { %v1142_v24 = vmax.f32 %v1466_v33, 0.0  ;;  %v1076_v63 = vpop.f32.mrb[46].mxu0 }
 0x278   : > { %1173 = vst [vmem:[%s2309_s27 + $0xe0] sm:$0xff] %v1141_v10  ;;  %v1469_v42 = vadd.f32 %v1468_v50, %v1076_v63  ;;  %v1078_v31 = vpop.f32.mrb[47].mxu0 }
 0x279   : > { %1174 = vst [vmem:[%s2309_s27 + $0xe8] sm:$0xff] %v1142_v24  ;;  %v1472_v34 = vadd.f32 %v1471_v51, %v1078_v31 }
 0x27a   : > { %v1143_v8 = vmax.f32 %v1469_v42, 0.0 }
 0x27b   : > { %v1144_v39 = vmax.f32 %v1472_v34, 0.0 }
 0x27c   : > { %1175 = vst [vmem:[%s2309_s27 + $0xf0] sm:$0xff] %v1143_v8 }
 0x27d   : > { %1176 = vst [vmem:[%s2309_s27 + $0xf8] sm:$0xff] %v1144_v39 }
 0x27e   : > { %1586 = shalt.err (!%p1583_p5)
}
 0x27f   : > { %s1587_s13 = scalar_lea.hbm %s2394_s16, 4096  ;;  %s1591_s11 = scalar_lea.hbm %s2452_s5, 8192 }
 0x280   : > { %p1588_p4 = scmp.ne.s32.totalorder %s2394_s16, %s1587_s13  ;;  %p1592_p12 = scmp.lt.u32.totalorder %s2394_s16, %s2452_s5 }
 0x281   : > { %p1593_p1 = scmp.lt.u32.totalorder %s1591_s11, %s1587_s13  ;;  %p1595_p8 = scmp.lt.u32.totalorder %s1587_s13, %s2394_s16 }
 0x282   : > { %p1589_p7 = pnand %p1588_p4, %p2460_p9 }
 0x283   : > { %p1594_p3 = por %p1593_p1, %p1592_p12 }
 0x284   : > { %p1590_p10 = pneg %p1589_p7 }
 0x285   : > { %p1596_p11 = por %p1595_p8, %p1594_p3 }
 0x287   : > { %p1597_p0 = pnand %p1596_p11, %p1590_p10 }
 0x289   : > { %1600 = shalt.err (!%p1597_p0)
}
 0x28a   : > { %s1663_s30 = smov 256   ;;  %s1664_s14 = smov 16  }
 0x28b   : > { %1475 = dma.vmem_to_hbm [thread:$0]  (%p2460_p9), %s2396_s10, 4096, %s2394_s16, %s1178_s21, %s1663_s30, %s1663_s30, %s1664_s14  }
 0x28c PF: > { %s1208_s17 = sand.u32 1, %s1635_s18   ;;  %p2461_p6 = scmp.ne.s32.totalorder %s2457_s8, 0 }
 0x28d   : > { %p2462_p13 = scmp.ge.s32.totalorder %s1655_s23, 2  ;;  %s1209_s24 = scalar_lea.sflag [#allocation4], %s1208_s17 }
 0x28f   : > { %p1482_p2 = pnand %p2462_p13, %p2461_p6 }
 0x291   : > { %1630 = dma.done.wait (!%p1482_p2), %s1209_s24, 4096  }
 0x292   : > { %1632 = vsyncadd (!%p1482_p2), %s1209_s24, 4294963200  ;;  %s21_s23 = sadd.s32 1, %s1655_s23   ;;  %s2463_s18 = smov %s1639_s19 }
 0x293   : > { %p18_p5 = scmp.ge.s32.totalorder %s21_s23, 4   ;;  %s2464_s19 = smov %s1643_s20 }
 0x294   : > { %s2465_s20 = smov %s1751_s7  ;;  %s2466_s21 = smov %s1651_s22 }
 0x295   : > { %s2467_s22 = smov %s2469_s26  ;;  %20 = sbr.rel (!%p18_p5) target bundleno = 6 (0x6), region = 85 }
 0x29c   :  { %1214 = vsyncpa [#allocation3], 1 }
 0x29d   :  { %1216 = vsyncpa [#allocation3 + $0x1], 1 }
 0x29e   :  { %1217 = vsyncpa [#allocation4], 1 }
 0x29f   :  { %1219 = vsyncpa [#allocation4 + $0x1], 1 }

</bundles_post_ra>
